<compile_context>
chip_gen: v5e
topology: v5e:2x2
jax: 0.10.0
libtpu: 0.0.40
codegen_flags: <defaults>
</compile_context>

<pallas_src>
import math

import jax
import jax.numpy as jnp
from jax.experimental import pallas as pl
from jax.experimental.pallas import tpu as pltpu


def num_embedding_kernel(col_ref, x_ref, bias_ref, o_ref):
    # col_ref : (1, C, H)   resident across grid steps
    # x_ref   : (TB, C, 1)  batch tile of feature values (any float dtype)
    # bias_ref: (1, 1, H)   resident
    # o_ref   : (TB, C, H)  f32 output tile
    col = col_ref[...].astype(jnp.float32)
    x = x_ref[...].astype(jnp.float32)        # mirrors .float() in the PyTorch forward
    bias = bias_ref[...].astype(jnp.float32)
    o_ref[...] = col * x + bias               # pure VPU broadcast multiply-add


def num_embedding(col_emb: jax.Array, x_ts: jax.Array, num_bias: jax.Array,
                  *, target_tile_bytes: int = 512 * 1024) -> jax.Array:
    """col_emb: (C, H), x_ts: (B, C), num_bias: (1, 1, H) -> (B, C, H) float32."""
    C, H = col_emb.shape
    B, C2 = x_ts.shape
    assert C == C2, "x_ts second dim must equal number of numerical columns"

    # Free (metadata-only) reshapes so all kernel broadcasts are rank-aligned
    # and the size-1 broadcast axis of x sits on the lane dimension.
    col3 = col_emb.reshape(1, C, H)
    x3 = x_ts.reshape(B, C, 1)
    bias3 = num_bias.reshape(1, 1, H)

    # Batch-tile size: ~target_tile_bytes per f32 output tile (double-buffered by
    # the Pallas pipeline). Leading block dim has no (8,128) constraint, but keep
    # it a multiple of 8 when possible for tidy sublane packing.
    bytes_per_row = C * H * 4
    tb = int(min(B, max(1, target_tile_bytes // max(1, bytes_per_row))))
    if tb >= 8:
        tb = (tb // 8) * 8
    grid = (pl.cdiv(B, tb),)

    out_bytes = B * C * H * 4
    in_bytes = (x_ts.size * jnp.dtype(x_ts.dtype).itemsize
                + col_emb.size * jnp.dtype(col_emb.dtype).itemsize
                + num_bias.size * jnp.dtype(num_bias.dtype).itemsize)
    cost = pl.CostEstimate(flops=2 * B * C * H, transcendentals=0,
                           bytes_accessed=int(out_bytes + in_bytes))

    return pl.pallas_call(
        num_embedding_kernel,
        out_shape=jax.ShapeDtypeStruct((B, C, H), jnp.float32),
        grid=grid,
        in_specs=[
            pl.BlockSpec((1, C, H), lambda i: (0, 0, 0)),   # col_emb: resident
            pl.BlockSpec((tb, C, 1), lambda i: (i, 0, 0)),  # x: batch-tiled
            pl.BlockSpec((1, 1, H), lambda i: (0, 0, 0)),   # bias: resident
        ],
        out_specs=pl.BlockSpec((tb, C, H), lambda i: (i, 0, 0)),
        compiler_params=pltpu.CompilerParams(
            dimension_semantics=("parallel",),
        ),
        cost_estimate=cost,
    )(col3, x3, bias3)


def _reference(col_emb, x_ts, num_bias):
    return (col_emb.astype(jnp.float32)[None, :, :]
            * x_ts[:, :, None].astype(jnp.float32)
            + num_bias.astype(jnp.float32))


if __name__ == "__main__":
    key = jax.random.PRNGKey(0)
    k_col, k_x, k_bias = jax.random.split(key, 3)

    # --- Config 1: lane-dense hidden (H multiple of 128), multi-step pipelined grid.
    hidden_dim, num_cols, batch = 128, 8, 512
    bound = 1.0 / math.sqrt(hidden_dim)
    num_bias = jax.random.uniform(k_bias, (1, 1, hidden_dim), dtype=jnp.float32,
                                  minval=-bound, maxval=bound)
    col_emb = jax.random.normal(k_col, (num_cols, hidden_dim), dtype=jnp.float32)
    x_ts = jax.random.normal(k_x, (batch, num_cols), dtype=jnp.float32)

    out = jax.block_until_ready(num_embedding(col_emb, x_ts, num_bias))
    ref = _reference(col_emb, x_ts, num_bias)
    assert out.shape == (batch, num_cols, hidden_dim)
    assert jnp.allclose(out, ref, atol=1e-6, rtol=1e-6)

    # --- Config 2: tiny original-style config (H=32), bf16 inputs cast in-kernel.
    hidden_dim2, num_cols2, batch2 = 32, 8, 4
    bound2 = 1.0 / math.sqrt(hidden_dim2)
    num_bias2 = jax.random.uniform(k_bias, (1, 1, hidden_dim2), dtype=jnp.float32,
                                   minval=-bound2, maxval=bound2)
    col_emb2 = jax.random.normal(k_col, (num_cols2, hidden_dim2)).astype(jnp.bfloat16)
    x_ts2 = jax.random.normal(k_x, (batch2, num_cols2)).astype(jnp.bfloat16)

    out2 = jax.block_until_ready(num_embedding(col_emb2, x_ts2, num_bias2))
    ref2 = _reference(col_emb2, x_ts2, num_bias2)
    assert out2.shape == (batch2, num_cols2, hidden_dim2)
    assert jnp.allclose(out2, ref2, atol=1e-6, rtol=1e-6)

    print("KERNEL_OK")
</pallas_src>

<mosaic_0001>
module attributes {stable_mosaic.version = 11 : i64} {
  func.func @num_embedding_kernel(%arg0: i32, %arg1: memref<1x8x128xf32, #tpu.memory_space<vmem>>, %arg2: memref<128x8x1xf32, #tpu.memory_space<vmem>>, %arg3: memref<1x1x128xf32, #tpu.memory_space<vmem>>, %arg4: memref<128x8x128xf32, #tpu.memory_space<vmem>>) attributes {dimension_semantics = [#tpu.dimension_semantics<parallel>], iteration_bounds = array<i64: 4>, scalar_prefetch = 0 : i64, scratch_operands = 0 : i64, tpu.core_type = #tpu.core_type<tc>, window_params = [{pipeline_mode = #tpu.pipeline_mode<synchronous>, transform_indices = @transform_0, window_bounds = array<i64: 1, 8, 128>}, {transform_indices = @transform_1, window_bounds = array<i64: 128, 8, 1>}, {pipeline_mode = #tpu.pipeline_mode<synchronous>, transform_indices = @transform_2, window_bounds = array<i64: 1, 1, 128>}, {transform_indices = @transform_3, window_bounds = array<i64: 128, 8, 128>}]} {
    %c0 = arith.constant 0 : index
    %c0_0 = arith.constant 0 : index
    %c0_1 = arith.constant 0 : index
    %0 = vector.load %arg1[%c0, %c0_0, %c0_1] : memref<1x8x128xf32, #tpu.memory_space<vmem>>, vector<1x8x128xf32>
    %c0_2 = arith.constant 0 : index
    %c0_3 = arith.constant 0 : index
    %c0_4 = arith.constant 0 : index
    %1 = vector.load %arg2[%c0_2, %c0_3, %c0_4] : memref<128x8x1xf32, #tpu.memory_space<vmem>>, vector<128x8x1xf32>
    %c0_5 = arith.constant 0 : index
    %c0_6 = arith.constant 0 : index
    %c0_7 = arith.constant 0 : index
    %2 = vector.load %arg3[%c0_5, %c0_6, %c0_7] : memref<1x1x128xf32, #tpu.memory_space<vmem>>, vector<1x1x128xf32>
    %3 = vector.broadcast %0 : vector<1x8x128xf32> to vector<128x8x128xf32>
    %4 = vector.broadcast %1 : vector<128x8x1xf32> to vector<128x8x128xf32>
    %5 = arith.mulf %3, %4 : vector<128x8x128xf32>
    %6 = vector.broadcast %2 : vector<1x1x128xf32> to vector<128x8x128xf32>
    %7 = arith.addf %5, %6 : vector<128x8x128xf32>
    %c0_8 = arith.constant 0 : index
    %c0_9 = arith.constant 0 : index
    %c0_10 = arith.constant 0 : index
    %8 = vector.load %arg4[%c0_8, %c0_9, %c0_10] : memref<128x8x128xf32, #tpu.memory_space<vmem>>, vector<128x8x128xf32>
    tpu.vector_store %arg4[%c0_8, %c0_9, %c0_10], %7 {strides = array<i32>} : memref<128x8x128xf32, #tpu.memory_space<vmem>>, vector<128x8x128xf32>,
    return
  }
  func.func @transform_0(%arg0: i32) -> (i32, i32, i32) {
    %c0_i32 = arith.constant 0 : i32
    %c0_i32_0 = arith.constant 0 : i32
    %c0_i32_1 = arith.constant 0 : i32
    %c0_i32_2 = arith.constant 0 : i32
    return %c0_i32, %c0_i32_0, %c0_i32_1 : i32, i32, i32
  }
  func.func @transform_1(%arg0: i32) -> (i32, i32, i32) {
    %c0_i32 = arith.constant 0 : i32
    %c0_i32_0 = arith.constant 0 : i32
    %c0_i32_1 = arith.constant 0 : i32
    return %arg0, %c0_i32, %c0_i32_0 : i32, i32, i32
  }
  func.func @transform_2(%arg0: i32) -> (i32, i32, i32) {
    %c0_i32 = arith.constant 0 : i32
    %c0_i32_0 = arith.constant 0 : i32
    %c0_i32_1 = arith.constant 0 : i32
    %c0_i32_2 = arith.constant 0 : i32
    return %c0_i32, %c0_i32_0, %c0_i32_1 : i32, i32, i32
  }
  func.func @transform_3(%arg0: i32) -> (i32, i32, i32) {
    %c0_i32 = arith.constant 0 : i32
    %c0_i32_0 = arith.constant 0 : i32
    %c0_i32_1 = arith.constant 0 : i32
    return %arg0, %c0_i32, %c0_i32_0 : i32, i32, i32
  }
}

</mosaic_0001>

<bundles_post_ra>
// kernel: tpu_custom_call.1
= control target key start
LH: loop header
LB: loop body
LE: loop exit
PB: predicated region body
PF: predicated region fallthrough
CT: control target
= control target key end

     0   :  { %8 = vsyncpa [#allocation3], 0  ;;  %s2180_s0 = inlined_call_operand.vmem [shape: f32[1,8,128], index: 0, kind: input, shape index: {}]   ;;  %s2181_s1 = inlined_call_operand.vmem [shape: f32[512,8,1], index: 1, kind: input, shape index: {}]   ;;  %s2182_s2 = inlined_call_operand.vmem [shape: f32[1,1,128], index: 2, kind: input, shape index: {}]   ;;  %s2183_s3 = inlined_call_operand.hbm [shape: f32[512,8,128], index: 3, kind: output, shape index: {}]  }
   0x1   :  { %10 = vsyncpa [#allocation3 + $0x1], 0  ;;  %s1555_s12 = smov 0   ;;  %s1557_s13 = smov 0  }
   0x2   :  { %s1559_s14 = smov 0   ;;  %s1561_s15 = smov 0  }
   0x3 LB: > { %s1576_s16 = sadd.s32 4294967295, %s1530_s15   ;;  %s1407_s17 = sadd.s32 4294967294, %s1530_s15   ;;  %s1530_s15 = sphi %s1561_s15, %s2189_s15   ;;  %s1526_s14 = sphi %s1559_s14, %s2188_s14   ;;  %s1522_s13 = sphi %s1557_s13, %s2187_s13   ;;  %s1518_s12 = sphi %s1555_s12, %s2186_s12  }
   0x4   : > { %s1580_s18 = sadd.s32 1, %s1530_s15   ;;  %s91_s19 = sadd.s32 1, %s1526_s14 }
   0x5   : > { %s88_s20 = ssub.s32 %s1530_s15, %s1580_s18  ;;  %p101_p0 = scmp.ne.s32.totalorder %s1526_s14, %s1522_s13 }
   0x6   : > { %p89_p1 = scmp.eq.s32.totalorder %s88_s20, 0  ;;  %p102_p2 = scmp.eq.s32.totalorder %s1576_s16, 3 }
   0x7   : > { %p107_p3 = scmp.ne.s32.totalorder %s1522_s13, %s1518_s12  ;;  %p108_p4 = scmp.eq.s32.totalorder %s1407_s17, 3 }
   0x8   : > { %s1591_s21 = scalar_select %p89_p1, %s1526_s14, %s91_s19  }
   0x9   : > { %p1593_p5 = por %p102_p2, %p101_p0  ;;  %p1597_p6 = por %p108_p4, %p107_p3 }
   0xa   : > { %p1410_p7 = scmp.ge.s32.totalorder %s1530_s15, 1  ;;  %p141_p8 = scmp.lt.s32.totalorder %s1530_s15, 5 }
   0xc   : > { %p142_p9 = pnand %p1410_p7, %p141_p8 }
   0xd   : > { %s1412_s24 = sshll.u32 (!%p142_p9), %s1576_s16, 7  ;;  %s162_s29 = sand.u32 (!%p142_p9), 1, %s1522_s13  }
   0xe   : > { %145 = sbr.rel (%p142_p9) target bundleno = 483 (0x1e3), region = 32  ;;  %p166_p10 = scmp.lt.s32.totalorder (!%p142_p9), %s1412_s24, 511 }
   0xf   : > { %s1411_s7 = sshll.u32 (!%p142_p9), %s162_s29, 10  ;;  %s1419_s19 = sshll.u32 (!%p142_p9), %s1576_s16, 10 }
  0x10   : > { %s1663_s8 = scalar_lea.vmem (!%p142_p9), [#allocation2], %s1411_s7  ;;  %s1330_s16 = scalar_lea.sflag (!%p142_p9), [#allocation3], %s162_s29 }
  0x11   : > { %s1342_s26 = sshll.u32 (!%p142_p9), %s1663_s8, 4  ;;  %s1488_s6 = scalar_lea.hbm (!%p142_p9), %s2183_s3, 4096  ;;  %s1343_s26 = int_to_ptr.vmem [resolvable:$true] %s1342_s26 }
  0x13   : > { %v1532_v0 = vmov 0   ;;  %s2191_s24 = smov (!%p166_p10, %s1412_s24), 511  ;;  %v1649_v37 = vld [vmem:[%s2180_s0] sm:$0xff] }
  0x14   : > { %1464 = vset.pattern.permute.xlu2 %v1532_v0  ;;  %1463 = vset.pattern.permute.xlu1 %v1532_v0  ;;  %s1413_s25 = sshll.u32 %s2191_s24, 3  ;;  %v1654_v39 = vld [vmem:[%s2182_s2] ss:$0 sm:$0xff] }
  0x15   : > { %1462 = vset.pattern.permute.xlu0 %v1532_v0  ;;  %s1607_s28 = scalar_lea.vmem %s2181_s1, %s1413_s25  ;;  %s1341_s25 = scalar_lea.hbm %s2183_s3, %s1419_s19 }
  0x16   : > { %v177_v1 = vld [vmem:[%s1607_s28 + $0x20] sm:$0xff]  ;;  %v175_v2 = vld [vmem:[%s1607_s28 + $0x10] sm:$0xff]  ;;  %v178_v4 = vld [vmem:[%s1607_s28 + $0x28] sm:$0xff]  ;;  %s1344_s27 = sshll.u32 %s1341_s25, 4  ;;  %s1345_s27 = int_to_ptr.hbm [resolvable:$true] %s1344_s27 }
  0x17   : > { %v173_v3 = vld [vmem:[%s1607_s28] sm:$0xff]  ;;  %324 = vperm.xlu2 %1464, %v177_v1   ;;  %314 = vperm.xlu1 %1463, %v175_v2   ;;  %v176_v5 = vld [vmem:[%s1607_s28 + $0x18] sm:$0xff]  ;;  %v174_v6 = vld [vmem:[%s1607_s28 + $0x8] sm:$0xff] }
  0x18   : > { %304 = vperm.xlu0 %1462, %v173_v3   ;;  %v181_v7 = vld [vmem:[%s1607_s28 + $0x40] sm:$0xff]  ;;  %v180_v8 = vld [vmem:[%s1607_s28 + $0x38] sm:$0xff]  ;;  %v179_v9 = vld [vmem:[%s1607_s28 + $0x30] sm:$0xff] }
  0x19   : > { %v184_v10 = vld [vmem:[%s1607_s28 + $0x58] sm:$0xff]  ;;  %v183_v11 = vld [vmem:[%s1607_s28 + $0x50] sm:$0xff]  ;;  %v182_v12 = vld [vmem:[%s1607_s28 + $0x48] sm:$0xff] }
  0x1a   : > { %v187_v13 = vld [vmem:[%s1607_s28 + $0x70] sm:$0xff]  ;;  %v186_v14 = vld [vmem:[%s1607_s28 + $0x68] sm:$0xff]  ;;  %v185_v15 = vld [vmem:[%s1607_s28 + $0x60] sm:$0xff] }
  0x1b   : > { %v190_v16 = vld [vmem:[%s1607_s28 + $0x88] sm:$0xff]  ;;  %v189_v17 = vld [vmem:[%s1607_s28 + $0x80] sm:$0xff]  ;;  %v188_v18 = vld [vmem:[%s1607_s28 + $0x78] sm:$0xff] }
  0x1c   : > { %v193_v19 = vld [vmem:[%s1607_s28 + $0xa0] sm:$0xff]  ;;  %v192_v20 = vld [vmem:[%s1607_s28 + $0x98] sm:$0xff]  ;;  %v191_v21 = vld [vmem:[%s1607_s28 + $0x90] sm:$0xff] }
  0x1d   : > { %v196_v22 = vld [vmem:[%s1607_s28 + $0xb8] sm:$0xff]  ;;  %v195_v23 = vld [vmem:[%s1607_s28 + $0xb0] sm:$0xff]  ;;  %v194_v24 = vld [vmem:[%s1607_s28 + $0xa8] sm:$0xff] }
  0x1e   : > { %v199_v25 = vld [vmem:[%s1607_s28 + $0xd0] sm:$0xff]  ;;  %v198_v26 = vld [vmem:[%s1607_s28 + $0xc8] sm:$0xff]  ;;  %v197_v27 = vld [vmem:[%s1607_s28 + $0xc0] sm:$0xff] }
  0x1f   : > { %329 = vperm.xlu2 %1464, %v178_v4   ;;  %319 = vperm.xlu1 %1463, %v176_v5   ;;  %v202_v28 = vld [vmem:[%s1607_s28 + $0xe8] sm:$0xff]  ;;  %v201_v29 = vld [vmem:[%s1607_s28 + $0xe0] sm:$0xff]  ;;  %v200_v30 = vld [vmem:[%s1607_s28 + $0xd8] sm:$0xff] }
  0x20   : > { %309 = vperm.xlu0 %1462, %v174_v6   ;;  %v205_v31 = vld [vmem:[%s1607_s28 + $0x100] sm:$0xff]  ;;  %v204_v32 = vld [vmem:[%s1607_s28 + $0xf8] sm:$0xff]  ;;  %v203_v33 = vld [vmem:[%s1607_s28 + $0xf0] sm:$0xff] }
  0x21   : > { %v208_v34 = vld [vmem:[%s1607_s28 + $0x118] sm:$0xff]  ;;  %v207_v35 = vld [vmem:[%s1607_s28 + $0x110] sm:$0xff]  ;;  %v206_v36 = vld [vmem:[%s1607_s28 + $0x108] sm:$0xff] }
  0x22   : > { %v211_v42 = vld [vmem:[%s1607_s28 + $0x130] sm:$0xff]  ;;  %v210_v43 = vld [vmem:[%s1607_s28 + $0x128] sm:$0xff]  ;;  %v209_v44 = vld [vmem:[%s1607_s28 + $0x120] sm:$0xff] }
  0x23   : > { %v214_v48 = vld [vmem:[%s1607_s28 + $0x148] sm:$0xff]  ;;  %v213_v49 = vld [vmem:[%s1607_s28 + $0x140] sm:$0xff]  ;;  %v212_v50 = vld [vmem:[%s1607_s28 + $0x138] sm:$0xff] }
  0x24   : > { %v217_v54 = vld [vmem:[%s1607_s28 + $0x160] sm:$0xff]  ;;  %v216_v55 = vld [vmem:[%s1607_s28 + $0x158] sm:$0xff]  ;;  %v215_v56 = vld [vmem:[%s1607_s28 + $0x150] sm:$0xff] }
  0x25   : > { %v220_v1 = vld [vmem:[%s1607_s28 + $0x178] sm:$0xff]  ;;  %v219_v2 = vld [vmem:[%s1607_s28 + $0x170] sm:$0xff]  ;;  %v218_v4 = vld [vmem:[%s1607_s28 + $0x168] sm:$0xff] }
  0x27   : > { %344 = vperm.xlu2 %1464, %v181_v7   ;;  %339 = vperm.xlu1 %1463, %v180_v8  }
  0x28   : > { %334 = vperm.xlu0 %1462, %v179_v9  }
  0x2f   : > { %359 = vperm.xlu2 %1464, %v184_v10   ;;  %354 = vperm.xlu1 %1463, %v183_v11  }
  0x30   : > { %349 = vperm.xlu0 %1462, %v182_v12  }
  0x37   : > { %374 = vperm.xlu2 %1464, %v187_v13   ;;  %369 = vperm.xlu1 %1463, %v186_v14   ;;  %v223_v13 = vld [vmem:[%s1607_s28 + $0x190] sm:$0xff]  ;;  %v222_v14 = vld [vmem:[%s1607_s28 + $0x188] sm:$0xff] }
  0x38   : > { %364 = vperm.xlu0 %1462, %v185_v15  }
  0x3f   : > { %389 = vperm.xlu2 %1464, %v190_v16   ;;  %384 = vperm.xlu1 %1463, %v189_v17   ;;  %v221_v16 = vld [vmem:[%s1607_s28 + $0x180] sm:$0xff] }
  0x40   : > { %379 = vperm.xlu0 %1462, %v188_v18  }
  0x47   : > { %404 = vperm.xlu2 %1464, %v193_v19   ;;  %399 = vperm.xlu1 %1463, %v192_v20  }
  0x48   : > { %394 = vperm.xlu0 %1462, %v191_v21  }
  0x4f   : > { %419 = vperm.xlu2 %1464, %v196_v22   ;;  %414 = vperm.xlu1 %1463, %v195_v23  }
  0x50   : > { %409 = vperm.xlu0 %1462, %v194_v24  }
  0x57   : > { %434 = vperm.xlu2 %1464, %v199_v25   ;;  %429 = vperm.xlu1 %1463, %v198_v26   ;;  %v226_v25 = vld [vmem:[%s1607_s28 + $0x1a8] sm:$0xff]  ;;  %v225_v26 = vld [vmem:[%s1607_s28 + $0x1a0] sm:$0xff] }
  0x58   : > { %424 = vperm.xlu0 %1462, %v197_v27  }
  0x5f   : > { %449 = vperm.xlu2 %1464, %v202_v28   ;;  %444 = vperm.xlu1 %1463, %v201_v29   ;;  %v224_v28 = vld [vmem:[%s1607_s28 + $0x198] sm:$0xff] }
  0x60   : > { %439 = vperm.xlu0 %1462, %v200_v30  }
  0x67   : > { %464 = vperm.xlu2 %1464, %v205_v31   ;;  %459 = vperm.xlu1 %1463, %v204_v32  }
  0x68   : > { %454 = vperm.xlu0 %1462, %v203_v33  }
  0x6f   : > { %479 = vperm.xlu2 %1464, %v208_v34   ;;  %474 = vperm.xlu1 %1463, %v207_v35  }
  0x70   : > { %469 = vperm.xlu0 %1462, %v206_v36  }
  0x71   : > { %v325_v38 = vpop.permute.xlu2 %324 }
  0x72   : > { %v946_v40 = vmul.f32 %v325_v38, %v1649_v37  ;;  %v229_v38 = vld [vmem:[%s1607_s28 + $0x1c0] sm:$0xff] }
  0x74   : > { %v1077_v41 = vadd.f32 %v1654_v39, %v946_v40  ;;  %v228_v40 = vld [vmem:[%s1607_s28 + $0x1b8] sm:$0xff] }
  0x76   : > { %1205 = vst [vmem:[%s1663_s8 + $0x20] sm:$0xff] %v1077_v41 }
  0x77   : > { %494 = vperm.xlu2 %1464, %v211_v42   ;;  %489 = vperm.xlu1 %1463, %v210_v43   ;;  %v227_v42 = vld [vmem:[%s1607_s28 + $0x1b0] sm:$0xff] }
  0x78   : > { %484 = vperm.xlu0 %1462, %v209_v44  }
  0x79   : > { %v330_v45 = vpop.permute.xlu2 %329 }
  0x7a   : > { %v947_v46 = vmul.f32 %v330_v45, %v1649_v37 }
  0x7c   : > { %v1078_v47 = vadd.f32 %v1654_v39, %v947_v46 }
  0x7e   : > { %1206 = vst [vmem:[%s1663_s8 + $0x28] sm:$0xff] %v1078_v47 }
  0x7f   : > { %509 = vperm.xlu2 %1464, %v214_v48   ;;  %504 = vperm.xlu1 %1463, %v213_v49  }
  0x80   : > { %499 = vperm.xlu0 %1462, %v212_v50  }
  0x81   : > { %v345_v51 = vpop.permute.xlu2 %344 }
  0x82   : > { %v950_v52 = vmul.f32 %v345_v51, %v1649_v37  ;;  %v232_v51 = vld [vmem:[%s1607_s28 + $0x1d8] sm:$0xff] }
  0x84   : > { %v1081_v53 = vadd.f32 %v1654_v39, %v950_v52  ;;  %v231_v52 = vld [vmem:[%s1607_s28 + $0x1d0] sm:$0xff] }
  0x86   : > { %1209 = vst [vmem:[%s1663_s8 + $0x40] sm:$0xff] %v1081_v53 }
  0x87   : > { %524 = vperm.xlu2 %1464, %v217_v54   ;;  %519 = vperm.xlu1 %1463, %v216_v55   ;;  %v230_v54 = vld [vmem:[%s1607_s28 + $0x1c8] sm:$0xff] }
  0x88   : > { %514 = vperm.xlu0 %1462, %v215_v56  }
  0x89   : > { %v360_v57 = vpop.permute.xlu2 %359  ;;  %v315_v58 = vpop.permute.xlu1 %314 }
  0x8a   : > { %v953_v59 = vmul.f32 %v360_v57, %v1649_v37  ;;  %v944_v60 = vmul.f32 %v315_v58, %v1649_v37  ;;  %v305_v61 = vpop.permute.xlu0 %304 }
  0x8b   : > { %v942_v62 = vmul.f32 %v305_v61, %v1649_v37 }
  0x8c   : > { %v1084_v63 = vadd.f32 %v1654_v39, %v953_v59  ;;  %v1075_v0 = vadd.f32 %v1654_v39, %v944_v60 }
  0x8d   : > { %v1073_v3 = vadd.f32 %v1654_v39, %v942_v62 }
  0x8e   : > { %1212 = vst [vmem:[%s1663_s8 + $0x58] sm:$0xff] %v1084_v63  ;;  %v235_v63 = vld [vmem:[%s1607_s28 + $0x1f0] sm:$0xff] }
  0x8f   : > { %1203 = vst [vmem:[%s1663_s8 + $0x10] sm:$0xff] %v1075_v0  ;;  %539 = vperm.xlu2 %1464, %v220_v1   ;;  %534 = vperm.xlu1 %1463, %v219_v2   ;;  %v234_v0 = vld [vmem:[%s1607_s28 + $0x1e8] sm:$0xff]  ;;  %v233_v2 = vld [vmem:[%s1607_s28 + $0x1e0] sm:$0xff] }
  0x90   : > { %1201 = vst [vmem:[%s1663_s8] sm:$0xff] %v1073_v3  ;;  %529 = vperm.xlu0 %1462, %v218_v4  }
  0x91   : > { %v375_v5 = vpop.permute.xlu2 %374  ;;  %v320_v6 = vpop.permute.xlu1 %319 }
  0x92   : > { %v956_v7 = vmul.f32 %v375_v5, %v1649_v37  ;;  %v945_v8 = vmul.f32 %v320_v6, %v1649_v37  ;;  %v310_v9 = vpop.permute.xlu0 %309 }
  0x93   : > { %v943_v10 = vmul.f32 %v310_v9, %v1649_v37 }
  0x94   : > { %v1087_v11 = vadd.f32 %v1654_v39, %v956_v7  ;;  %v1076_v12 = vadd.f32 %v1654_v39, %v945_v8 }
  0x95   : > { %v1074_v15 = vadd.f32 %v1654_v39, %v943_v10 }
  0x96   : > { %1215 = vst [vmem:[%s1663_s8 + $0x70] sm:$0xff] %v1087_v11  ;;  %v238_v11 = vld [vmem:[%s1607_s28 + $0x208] sm:$0xff] }
  0x97   : > { %1204 = vst [vmem:[%s1663_s8 + $0x18] sm:$0xff] %v1076_v12  ;;  %554 = vperm.xlu2 %1464, %v223_v13   ;;  %549 = vperm.xlu1 %1463, %v222_v14   ;;  %v237_v12 = vld [vmem:[%s1607_s28 + $0x200] sm:$0xff]  ;;  %v236_v14 = vld [vmem:[%s1607_s28 + $0x1f8] sm:$0xff] }
  0x98   : > { %1202 = vst [vmem:[%s1663_s8 + $0x8] sm:$0xff] %v1074_v15  ;;  %544 = vperm.xlu0 %1462, %v221_v16  }
  0x99   : > { %v390_v17 = vpop.permute.xlu2 %389  ;;  %v340_v18 = vpop.permute.xlu1 %339 }
  0x9a   : > { %v959_v19 = vmul.f32 %v390_v17, %v1649_v37  ;;  %v949_v20 = vmul.f32 %v340_v18, %v1649_v37  ;;  %v335_v21 = vpop.permute.xlu0 %334 }
  0x9b   : > { %v948_v22 = vmul.f32 %v335_v21, %v1649_v37 }
  0x9c   : > { %v1090_v23 = vadd.f32 %v1654_v39, %v959_v19  ;;  %v1080_v24 = vadd.f32 %v1654_v39, %v949_v20 }
  0x9d   : > { %v1079_v27 = vadd.f32 %v1654_v39, %v948_v22 }
  0x9e   : > { %1218 = vst [vmem:[%s1663_s8 + $0x88] sm:$0xff] %v1090_v23  ;;  %v241_v23 = vld [vmem:[%s1607_s28 + $0x220] sm:$0xff] }
  0x9f   : > { %1208 = vst [vmem:[%s1663_s8 + $0x38] sm:$0xff] %v1080_v24  ;;  %569 = vperm.xlu2 %1464, %v226_v25   ;;  %564 = vperm.xlu1 %1463, %v225_v26   ;;  %v240_v24 = vld [vmem:[%s1607_s28 + $0x218] sm:$0xff]  ;;  %v239_v26 = vld [vmem:[%s1607_s28 + $0x210] sm:$0xff] }
  0xa0   : > { %1207 = vst [vmem:[%s1663_s8 + $0x30] sm:$0xff] %v1079_v27  ;;  %559 = vperm.xlu0 %1462, %v224_v28  }
  0xa1   : > { %v405_v29 = vpop.permute.xlu2 %404  ;;  %v355_v30 = vpop.permute.xlu1 %354 }
  0xa2   : > { %v962_v31 = vmul.f32 %v405_v29, %v1649_v37  ;;  %v952_v32 = vmul.f32 %v355_v30, %v1649_v37  ;;  %v350_v33 = vpop.permute.xlu0 %349 }
  0xa3   : > { %v951_v34 = vmul.f32 %v350_v33, %v1649_v37 }
  0xa4   : > { %v1093_v35 = vadd.f32 %v1654_v39, %v962_v31  ;;  %v1083_v36 = vadd.f32 %v1654_v39, %v952_v32 }
  0xa5   : > { %v1082_v41 = vadd.f32 %v1654_v39, %v951_v34 }
  0xa6   : > { %1221 = vst [vmem:[%s1663_s8 + $0xa0] sm:$0xff] %v1093_v35  ;;  %v244_v35 = vld [vmem:[%s1607_s28 + $0x238] sm:$0xff] }
  0xa7   : > { %1211 = vst [vmem:[%s1663_s8 + $0x50] sm:$0xff] %v1083_v36  ;;  %584 = vperm.xlu2 %1464, %v229_v38   ;;  %579 = vperm.xlu1 %1463, %v228_v40   ;;  %v243_v36 = vld [vmem:[%s1607_s28 + $0x230] sm:$0xff]  ;;  %v242_v40 = vld [vmem:[%s1607_s28 + $0x228] sm:$0xff] }
  0xa8   : > { %1210 = vst [vmem:[%s1663_s8 + $0x48] sm:$0xff] %v1082_v41  ;;  %574 = vperm.xlu0 %1462, %v227_v42  }
  0xa9   : > { %v420_v43 = vpop.permute.xlu2 %419  ;;  %v370_v44 = vpop.permute.xlu1 %369 }
  0xaa   : > { %v965_v45 = vmul.f32 %v420_v43, %v1649_v37  ;;  %v955_v46 = vmul.f32 %v370_v44, %v1649_v37  ;;  %v365_v47 = vpop.permute.xlu0 %364 }
  0xab   : > { %v954_v48 = vmul.f32 %v365_v47, %v1649_v37 }
  0xac   : > { %v1096_v49 = vadd.f32 %v1654_v39, %v965_v45  ;;  %v1086_v50 = vadd.f32 %v1654_v39, %v955_v46 }
  0xad   : > { %v1085_v53 = vadd.f32 %v1654_v39, %v954_v48 }
  0xae   : > { %1224 = vst [vmem:[%s1663_s8 + $0xb8] sm:$0xff] %v1096_v49  ;;  %v247_v49 = vld [vmem:[%s1607_s28 + $0x250] sm:$0xff] }
  0xaf   : > { %1214 = vst [vmem:[%s1663_s8 + $0x68] sm:$0xff] %v1086_v50  ;;  %599 = vperm.xlu2 %1464, %v232_v51   ;;  %594 = vperm.xlu1 %1463, %v231_v52   ;;  %v246_v50 = vld [vmem:[%s1607_s28 + $0x248] sm:$0xff]  ;;  %v245_v52 = vld [vmem:[%s1607_s28 + $0x240] sm:$0xff] }
  0xb0   : > { %1213 = vst [vmem:[%s1663_s8 + $0x60] sm:$0xff] %v1085_v53  ;;  %589 = vperm.xlu0 %1462, %v230_v54  }
  0xb1   : > { %v435_v55 = vpop.permute.xlu2 %434  ;;  %v385_v56 = vpop.permute.xlu1 %384 }
  0xb2   : > { %v968_v57 = vmul.f32 %v435_v55, %v1649_v37  ;;  %v958_v58 = vmul.f32 %v385_v56, %v1649_v37  ;;  %v380_v59 = vpop.permute.xlu0 %379 }
  0xb3   : > { %v957_v60 = vmul.f32 %v380_v59, %v1649_v37 }
  0xb4   : > { %v1099_v61 = vadd.f32 %v1654_v39, %v968_v57  ;;  %v1089_v62 = vadd.f32 %v1654_v39, %v958_v58 }
  0xb5   : > { %v1088_v1 = vadd.f32 %v1654_v39, %v957_v60 }
  0xb6   : > { %1227 = vst [vmem:[%s1663_s8 + $0xd0] sm:$0xff] %v1099_v61  ;;  %v250_v61 = vld [vmem:[%s1607_s28 + $0x268] sm:$0xff] }
  0xb7   : > { %1217 = vst [vmem:[%s1663_s8 + $0x80] sm:$0xff] %v1089_v62  ;;  %614 = vperm.xlu2 %1464, %v235_v63   ;;  %609 = vperm.xlu1 %1463, %v234_v0   ;;  %v249_v62 = vld [vmem:[%s1607_s28 + $0x260] sm:$0xff]  ;;  %v248_v0 = vld [vmem:[%s1607_s28 + $0x258] sm:$0xff] }
  0xb8   : > { %1216 = vst [vmem:[%s1663_s8 + $0x78] sm:$0xff] %v1088_v1  ;;  %604 = vperm.xlu0 %1462, %v233_v2  }
  0xb9   : > { %v450_v3 = vpop.permute.xlu2 %449  ;;  %v400_v4 = vpop.permute.xlu1 %399 }
  0xba   : > { %v971_v5 = vmul.f32 %v450_v3, %v1649_v37  ;;  %v961_v6 = vmul.f32 %v400_v4, %v1649_v37  ;;  %v395_v7 = vpop.permute.xlu0 %394 }
  0xbb   : > { %v960_v8 = vmul.f32 %v395_v7, %v1649_v37 }
  0xbc   : > { %v1102_v9 = vadd.f32 %v1654_v39, %v971_v5  ;;  %v1092_v10 = vadd.f32 %v1654_v39, %v961_v6 }
  0xbd   : > { %v1091_v13 = vadd.f32 %v1654_v39, %v960_v8 }
  0xbe   : > { %1230 = vst [vmem:[%s1663_s8 + $0xe8] sm:$0xff] %v1102_v9  ;;  %v253_v9 = vld [vmem:[%s1607_s28 + $0x280] sm:$0xff] }
  0xbf   : > { %1220 = vst [vmem:[%s1663_s8 + $0x98] sm:$0xff] %v1092_v10  ;;  %629 = vperm.xlu2 %1464, %v238_v11   ;;  %624 = vperm.xlu1 %1463, %v237_v12   ;;  %v252_v10 = vld [vmem:[%s1607_s28 + $0x278] sm:$0xff]  ;;  %v251_v12 = vld [vmem:[%s1607_s28 + $0x270] sm:$0xff] }
  0xc0   : > { %1219 = vst [vmem:[%s1663_s8 + $0x90] sm:$0xff] %v1091_v13  ;;  %619 = vperm.xlu0 %1462, %v236_v14  }
  0xc1   : > { %v465_v15 = vpop.permute.xlu2 %464  ;;  %v415_v16 = vpop.permute.xlu1 %414 }
  0xc2   : > { %v974_v17 = vmul.f32 %v465_v15, %v1649_v37  ;;  %v964_v18 = vmul.f32 %v415_v16, %v1649_v37  ;;  %v410_v19 = vpop.permute.xlu0 %409 }
  0xc3   : > { %v963_v20 = vmul.f32 %v410_v19, %v1649_v37 }
  0xc4   : > { %v1105_v21 = vadd.f32 %v1654_v39, %v974_v17  ;;  %v1095_v22 = vadd.f32 %v1654_v39, %v964_v18 }
  0xc5   : > { %v1094_v25 = vadd.f32 %v1654_v39, %v963_v20 }
  0xc6   : > { %1233 = vst [vmem:[%s1663_s8 + $0x100] sm:$0xff] %v1105_v21  ;;  %v256_v21 = vld [vmem:[%s1607_s28 + $0x298] sm:$0xff] }
  0xc7   : > { %1223 = vst [vmem:[%s1663_s8 + $0xb0] sm:$0xff] %v1095_v22  ;;  %644 = vperm.xlu2 %1464, %v241_v23   ;;  %639 = vperm.xlu1 %1463, %v240_v24   ;;  %v255_v22 = vld [vmem:[%s1607_s28 + $0x290] sm:$0xff]  ;;  %v254_v24 = vld [vmem:[%s1607_s28 + $0x288] sm:$0xff] }
  0xc8   : > { %1222 = vst [vmem:[%s1663_s8 + $0xa8] sm:$0xff] %v1094_v25  ;;  %634 = vperm.xlu0 %1462, %v239_v26  }
  0xc9   : > { %v480_v27 = vpop.permute.xlu2 %479  ;;  %v430_v28 = vpop.permute.xlu1 %429 }
  0xca   : > { %v977_v29 = vmul.f32 %v480_v27, %v1649_v37  ;;  %v967_v30 = vmul.f32 %v430_v28, %v1649_v37  ;;  %v425_v31 = vpop.permute.xlu0 %424 }
  0xcb   : > { %v966_v32 = vmul.f32 %v425_v31, %v1649_v37 }
  0xcc   : > { %v1108_v33 = vadd.f32 %v1654_v39, %v977_v29  ;;  %v1098_v34 = vadd.f32 %v1654_v39, %v967_v30 }
  0xcd   : > { %v1097_v38 = vadd.f32 %v1654_v39, %v966_v32 }
  0xce   : > { %1236 = vst [vmem:[%s1663_s8 + $0x118] sm:$0xff] %v1108_v33  ;;  %v259_v33 = vld [vmem:[%s1607_s28 + $0x2b0] sm:$0xff] }
  0xcf   : > { %1226 = vst [vmem:[%s1663_s8 + $0xc8] sm:$0xff] %v1098_v34  ;;  %659 = vperm.xlu2 %1464, %v244_v35   ;;  %654 = vperm.xlu1 %1463, %v243_v36   ;;  %v258_v34 = vld [vmem:[%s1607_s28 + $0x2a8] sm:$0xff]  ;;  %v257_v36 = vld [vmem:[%s1607_s28 + $0x2a0] sm:$0xff] }
  0xd0   : > { %1225 = vst [vmem:[%s1663_s8 + $0xc0] sm:$0xff] %v1097_v38  ;;  %649 = vperm.xlu0 %1462, %v242_v40  }
  0xd1   : > { %v495_v41 = vpop.permute.xlu2 %494  ;;  %v445_v42 = vpop.permute.xlu1 %444 }
  0xd2   : > { %v980_v43 = vmul.f32 %v495_v41, %v1649_v37  ;;  %v970_v44 = vmul.f32 %v445_v42, %v1649_v37  ;;  %v440_v45 = vpop.permute.xlu0 %439 }
  0xd3   : > { %v969_v46 = vmul.f32 %v440_v45, %v1649_v37 }
  0xd4   : > { %v1111_v47 = vadd.f32 %v1654_v39, %v980_v43  ;;  %v1101_v48 = vadd.f32 %v1654_v39, %v970_v44 }
  0xd5   : > { %v1100_v51 = vadd.f32 %v1654_v39, %v969_v46 }
  0xd6   : > { %1239 = vst [vmem:[%s1663_s8 + $0x130] sm:$0xff] %v1111_v47  ;;  %v262_v47 = vld [vmem:[%s1607_s28 + $0x2c8] sm:$0xff] }
  0xd7   : > { %1229 = vst [vmem:[%s1663_s8 + $0xe0] sm:$0xff] %v1101_v48  ;;  %674 = vperm.xlu2 %1464, %v247_v49   ;;  %669 = vperm.xlu1 %1463, %v246_v50   ;;  %v261_v48 = vld [vmem:[%s1607_s28 + $0x2c0] sm:$0xff]  ;;  %v260_v50 = vld [vmem:[%s1607_s28 + $0x2b8] sm:$0xff] }
  0xd8   : > { %1228 = vst [vmem:[%s1663_s8 + $0xd8] sm:$0xff] %v1100_v51  ;;  %664 = vperm.xlu0 %1462, %v245_v52  }
  0xd9   : > { %v510_v53 = vpop.permute.xlu2 %509  ;;  %v460_v54 = vpop.permute.xlu1 %459 }
  0xda   : > { %v983_v55 = vmul.f32 %v510_v53, %v1649_v37  ;;  %v973_v56 = vmul.f32 %v460_v54, %v1649_v37  ;;  %v455_v57 = vpop.permute.xlu0 %454 }
  0xdb   : > { %v972_v58 = vmul.f32 %v455_v57, %v1649_v37 }
  0xdc   : > { %v1114_v59 = vadd.f32 %v1654_v39, %v983_v55  ;;  %v1104_v60 = vadd.f32 %v1654_v39, %v973_v56 }
  0xdd   : > { %v1103_v63 = vadd.f32 %v1654_v39, %v972_v58 }
  0xde   : > { %1242 = vst [vmem:[%s1663_s8 + $0x148] sm:$0xff] %v1114_v59  ;;  %v265_v59 = vld [vmem:[%s1607_s28 + $0x2e0] sm:$0xff] }
  0xdf   : > { %1232 = vst [vmem:[%s1663_s8 + $0xf8] sm:$0xff] %v1104_v60  ;;  %689 = vperm.xlu2 %1464, %v250_v61   ;;  %684 = vperm.xlu1 %1463, %v249_v62   ;;  %v264_v60 = vld [vmem:[%s1607_s28 + $0x2d8] sm:$0xff]  ;;  %v263_v62 = vld [vmem:[%s1607_s28 + $0x2d0] sm:$0xff] }
  0xe0   : > { %1231 = vst [vmem:[%s1663_s8 + $0xf0] sm:$0xff] %v1103_v63  ;;  %679 = vperm.xlu0 %1462, %v248_v0  }
  0xe1   : > { %v525_v1 = vpop.permute.xlu2 %524  ;;  %v475_v2 = vpop.permute.xlu1 %474 }
  0xe2   : > { %v986_v3 = vmul.f32 %v525_v1, %v1649_v37  ;;  %v976_v4 = vmul.f32 %v475_v2, %v1649_v37  ;;  %v470_v5 = vpop.permute.xlu0 %469 }
  0xe3   : > { %v975_v6 = vmul.f32 %v470_v5, %v1649_v37 }
  0xe4   : > { %v1117_v7 = vadd.f32 %v1654_v39, %v986_v3  ;;  %v1107_v8 = vadd.f32 %v1654_v39, %v976_v4 }
  0xe5   : > { %v1106_v11 = vadd.f32 %v1654_v39, %v975_v6 }
  0xe6   : > { %1245 = vst [vmem:[%s1663_s8 + $0x160] sm:$0xff] %v1117_v7  ;;  %v268_v7 = vld [vmem:[%s1607_s28 + $0x2f8] sm:$0xff] }
  0xe7   : > { %1235 = vst [vmem:[%s1663_s8 + $0x110] sm:$0xff] %v1107_v8  ;;  %704 = vperm.xlu2 %1464, %v253_v9   ;;  %699 = vperm.xlu1 %1463, %v252_v10   ;;  %v267_v8 = vld [vmem:[%s1607_s28 + $0x2f0] sm:$0xff]  ;;  %v266_v10 = vld [vmem:[%s1607_s28 + $0x2e8] sm:$0xff] }
  0xe8   : > { %1234 = vst [vmem:[%s1663_s8 + $0x108] sm:$0xff] %v1106_v11  ;;  %694 = vperm.xlu0 %1462, %v251_v12  }
  0xe9   : > { %v540_v13 = vpop.permute.xlu2 %539  ;;  %v490_v14 = vpop.permute.xlu1 %489 }
  0xea   : > { %v989_v15 = vmul.f32 %v540_v13, %v1649_v37  ;;  %v979_v16 = vmul.f32 %v490_v14, %v1649_v37  ;;  %v485_v17 = vpop.permute.xlu0 %484 }
  0xeb   : > { %v978_v18 = vmul.f32 %v485_v17, %v1649_v37 }
  0xec   : > { %v1120_v19 = vadd.f32 %v1654_v39, %v989_v15  ;;  %v1110_v20 = vadd.f32 %v1654_v39, %v979_v16 }
  0xed   : > { %v1109_v23 = vadd.f32 %v1654_v39, %v978_v18 }
  0xee   : > { %1248 = vst [vmem:[%s1663_s8 + $0x178] sm:$0xff] %v1120_v19  ;;  %v271_v19 = vld [vmem:[%s1607_s28 + $0x310] sm:$0xff] }
  0xef   : > { %1238 = vst [vmem:[%s1663_s8 + $0x128] sm:$0xff] %v1110_v20  ;;  %719 = vperm.xlu2 %1464, %v256_v21   ;;  %714 = vperm.xlu1 %1463, %v255_v22   ;;  %v270_v20 = vld [vmem:[%s1607_s28 + $0x308] sm:$0xff]  ;;  %v269_v22 = vld [vmem:[%s1607_s28 + $0x300] sm:$0xff] }
  0xf0   : > { %1237 = vst [vmem:[%s1663_s8 + $0x120] sm:$0xff] %v1109_v23  ;;  %709 = vperm.xlu0 %1462, %v254_v24  }
  0xf1   : > { %v555_v25 = vpop.permute.xlu2 %554  ;;  %v505_v26 = vpop.permute.xlu1 %504 }
  0xf2   : > { %v992_v27 = vmul.f32 %v555_v25, %v1649_v37  ;;  %v982_v28 = vmul.f32 %v505_v26, %v1649_v37  ;;  %v500_v29 = vpop.permute.xlu0 %499 }
  0xf3   : > { %v981_v30 = vmul.f32 %v500_v29, %v1649_v37 }
  0xf4   : > { %v1123_v31 = vadd.f32 %v1654_v39, %v992_v27  ;;  %v1113_v32 = vadd.f32 %v1654_v39, %v982_v28 }
  0xf5   : > { %v1112_v35 = vadd.f32 %v1654_v39, %v981_v30 }
  0xf6   : > { %1251 = vst [vmem:[%s1663_s8 + $0x190] sm:$0xff] %v1123_v31  ;;  %v274_v31 = vld [vmem:[%s1607_s28 + $0x328] sm:$0xff] }
  0xf7   : > { %1241 = vst [vmem:[%s1663_s8 + $0x140] sm:$0xff] %v1113_v32  ;;  %734 = vperm.xlu2 %1464, %v259_v33   ;;  %729 = vperm.xlu1 %1463, %v258_v34   ;;  %v273_v32 = vld [vmem:[%s1607_s28 + $0x320] sm:$0xff]  ;;  %v272_v34 = vld [vmem:[%s1607_s28 + $0x318] sm:$0xff] }
  0xf8   : > { %1240 = vst [vmem:[%s1663_s8 + $0x138] sm:$0xff] %v1112_v35  ;;  %724 = vperm.xlu0 %1462, %v257_v36  }
  0xf9   : > { %v570_v38 = vpop.permute.xlu2 %569  ;;  %v520_v40 = vpop.permute.xlu1 %519 }
  0xfa   : > { %v995_v41 = vmul.f32 %v570_v38, %v1649_v37  ;;  %v985_v42 = vmul.f32 %v520_v40, %v1649_v37  ;;  %v515_v43 = vpop.permute.xlu0 %514 }
  0xfb   : > { %v984_v44 = vmul.f32 %v515_v43, %v1649_v37 }
  0xfc   : > { %v1126_v45 = vadd.f32 %v1654_v39, %v995_v41  ;;  %v1116_v46 = vadd.f32 %v1654_v39, %v985_v42 }
  0xfd   : > { %v1115_v49 = vadd.f32 %v1654_v39, %v984_v44 }
  0xfe   : > { %1254 = vst [vmem:[%s1663_s8 + $0x1a8] sm:$0xff] %v1126_v45  ;;  %v277_v45 = vld [vmem:[%s1607_s28 + $0x340] sm:$0xff] }
  0xff   : > { %1244 = vst [vmem:[%s1663_s8 + $0x158] sm:$0xff] %v1116_v46  ;;  %749 = vperm.xlu2 %1464, %v262_v47   ;;  %744 = vperm.xlu1 %1463, %v261_v48   ;;  %v276_v46 = vld [vmem:[%s1607_s28 + $0x338] sm:$0xff]  ;;  %v275_v48 = vld [vmem:[%s1607_s28 + $0x330] sm:$0xff] }
 0x100   : > { %1243 = vst [vmem:[%s1663_s8 + $0x150] sm:$0xff] %v1115_v49  ;;  %739 = vperm.xlu0 %1462, %v260_v50  }
 0x101   : > { %v585_v51 = vpop.permute.xlu2 %584  ;;  %v535_v52 = vpop.permute.xlu1 %534 }
 0x102   : > { %v998_v53 = vmul.f32 %v585_v51, %v1649_v37  ;;  %v988_v54 = vmul.f32 %v535_v52, %v1649_v37  ;;  %v530_v55 = vpop.permute.xlu0 %529 }
 0x103   : > { %v987_v56 = vmul.f32 %v530_v55, %v1649_v37 }
 0x104   : > { %v1129_v57 = vadd.f32 %v1654_v39, %v998_v53  ;;  %v1119_v58 = vadd.f32 %v1654_v39, %v988_v54 }
 0x105   : > { %v1118_v61 = vadd.f32 %v1654_v39, %v987_v56 }
 0x106   : > { %1257 = vst [vmem:[%s1663_s8 + $0x1c0] sm:$0xff] %v1129_v57  ;;  %v280_v57 = vld [vmem:[%s1607_s28 + $0x358] sm:$0xff] }
 0x107   : > { %1247 = vst [vmem:[%s1663_s8 + $0x170] sm:$0xff] %v1119_v58  ;;  %764 = vperm.xlu2 %1464, %v265_v59   ;;  %759 = vperm.xlu1 %1463, %v264_v60   ;;  %v279_v58 = vld [vmem:[%s1607_s28 + $0x350] sm:$0xff]  ;;  %v278_v60 = vld [vmem:[%s1607_s28 + $0x348] sm:$0xff] }
 0x108   : > { %1246 = vst [vmem:[%s1663_s8 + $0x168] sm:$0xff] %v1118_v61  ;;  %754 = vperm.xlu0 %1462, %v263_v62  }
 0x109   : > { %v600_v63 = vpop.permute.xlu2 %599  ;;  %v550_v0 = vpop.permute.xlu1 %549 }
 0x10a   : > { %v1001_v1 = vmul.f32 %v600_v63, %v1649_v37  ;;  %v991_v2 = vmul.f32 %v550_v0, %v1649_v37  ;;  %v545_v3 = vpop.permute.xlu0 %544 }
 0x10b   : > { %v990_v4 = vmul.f32 %v545_v3, %v1649_v37 }
 0x10c   : > { %v1132_v5 = vadd.f32 %v1654_v39, %v1001_v1  ;;  %v1122_v6 = vadd.f32 %v1654_v39, %v991_v2 }
 0x10d   : > { %v1121_v9 = vadd.f32 %v1654_v39, %v990_v4 }
 0x10e   : > { %1260 = vst [vmem:[%s1663_s8 + $0x1d8] sm:$0xff] %v1132_v5  ;;  %v283_v5 = vld [vmem:[%s1607_s28 + $0x370] sm:$0xff] }
 0x10f   : > { %1250 = vst [vmem:[%s1663_s8 + $0x188] sm:$0xff] %v1122_v6  ;;  %779 = vperm.xlu2 %1464, %v268_v7   ;;  %774 = vperm.xlu1 %1463, %v267_v8   ;;  %v282_v6 = vld [vmem:[%s1607_s28 + $0x368] sm:$0xff]  ;;  %v281_v8 = vld [vmem:[%s1607_s28 + $0x360] sm:$0xff] }
 0x110   : > { %1249 = vst [vmem:[%s1663_s8 + $0x180] sm:$0xff] %v1121_v9  ;;  %769 = vperm.xlu0 %1462, %v266_v10  }
 0x111   : > { %v615_v11 = vpop.permute.xlu2 %614  ;;  %v565_v12 = vpop.permute.xlu1 %564 }
 0x112   : > { %v1004_v13 = vmul.f32 %v615_v11, %v1649_v37  ;;  %v994_v14 = vmul.f32 %v565_v12, %v1649_v37  ;;  %v560_v15 = vpop.permute.xlu0 %559 }
 0x113   : > { %v993_v16 = vmul.f32 %v560_v15, %v1649_v37 }
 0x114   : > { %v1135_v17 = vadd.f32 %v1654_v39, %v1004_v13  ;;  %v1125_v18 = vadd.f32 %v1654_v39, %v994_v14 }
 0x115   : > { %v1124_v21 = vadd.f32 %v1654_v39, %v993_v16 }
 0x116   : > { %1263 = vst [vmem:[%s1663_s8 + $0x1f0] sm:$0xff] %v1135_v17  ;;  %v286_v17 = vld [vmem:[%s1607_s28 + $0x388] sm:$0xff] }
 0x117   : > { %1253 = vst [vmem:[%s1663_s8 + $0x1a0] sm:$0xff] %v1125_v18  ;;  %794 = vperm.xlu2 %1464, %v271_v19   ;;  %789 = vperm.xlu1 %1463, %v270_v20   ;;  %v285_v18 = vld [vmem:[%s1607_s28 + $0x380] sm:$0xff]  ;;  %v284_v20 = vld [vmem:[%s1607_s28 + $0x378] sm:$0xff] }
 0x118   : > { %1252 = vst [vmem:[%s1663_s8 + $0x198] sm:$0xff] %v1124_v21  ;;  %784 = vperm.xlu0 %1462, %v269_v22  }
 0x119   : > { %v630_v23 = vpop.permute.xlu2 %629  ;;  %v580_v24 = vpop.permute.xlu1 %579 }
 0x11a   : > { %v1007_v25 = vmul.f32 %v630_v23, %v1649_v37  ;;  %v997_v26 = vmul.f32 %v580_v24, %v1649_v37  ;;  %v575_v27 = vpop.permute.xlu0 %574 }
 0x11b   : > { %v996_v28 = vmul.f32 %v575_v27, %v1649_v37 }
 0x11c   : > { %v1138_v29 = vadd.f32 %v1654_v39, %v1007_v25  ;;  %v1128_v30 = vadd.f32 %v1654_v39, %v997_v26 }
 0x11d   : > { %v1127_v33 = vadd.f32 %v1654_v39, %v996_v28 }
 0x11e   : > { %1266 = vst [vmem:[%s1663_s8 + $0x208] sm:$0xff] %v1138_v29  ;;  %v289_v29 = vld [vmem:[%s1607_s28 + $0x3a0] sm:$0xff] }
 0x11f   : > { %1256 = vst [vmem:[%s1663_s8 + $0x1b8] sm:$0xff] %v1128_v30  ;;  %809 = vperm.xlu2 %1464, %v274_v31   ;;  %804 = vperm.xlu1 %1463, %v273_v32   ;;  %v288_v30 = vld [vmem:[%s1607_s28 + $0x398] sm:$0xff]  ;;  %v287_v32 = vld [vmem:[%s1607_s28 + $0x390] sm:$0xff] }
 0x120   : > { %1255 = vst [vmem:[%s1663_s8 + $0x1b0] sm:$0xff] %v1127_v33  ;;  %799 = vperm.xlu0 %1462, %v272_v34  }
 0x121   : > { %v645_v35 = vpop.permute.xlu2 %644  ;;  %v595_v36 = vpop.permute.xlu1 %594 }
 0x122   : > { %v1010_v38 = vmul.f32 %v645_v35, %v1649_v37  ;;  %v1000_v40 = vmul.f32 %v595_v36, %v1649_v37  ;;  %v590_v41 = vpop.permute.xlu0 %589 }
 0x123   : > { %v999_v42 = vmul.f32 %v590_v41, %v1649_v37 }
 0x124   : > { %v1141_v43 = vadd.f32 %v1654_v39, %v1010_v38  ;;  %v1131_v44 = vadd.f32 %v1654_v39, %v1000_v40 }
 0x125   : > { %v1130_v47 = vadd.f32 %v1654_v39, %v999_v42 }
 0x126   : > { %1269 = vst [vmem:[%s1663_s8 + $0x220] sm:$0xff] %v1141_v43  ;;  %v292_v43 = vld [vmem:[%s1607_s28 + $0x3b8] sm:$0xff] }
 0x127   : > { %1259 = vst [vmem:[%s1663_s8 + $0x1d0] sm:$0xff] %v1131_v44  ;;  %824 = vperm.xlu2 %1464, %v277_v45   ;;  %819 = vperm.xlu1 %1463, %v276_v46   ;;  %v291_v44 = vld [vmem:[%s1607_s28 + $0x3b0] sm:$0xff]  ;;  %v290_v46 = vld [vmem:[%s1607_s28 + $0x3a8] sm:$0xff] }
 0x128   : > { %1258 = vst [vmem:[%s1663_s8 + $0x1c8] sm:$0xff] %v1130_v47  ;;  %814 = vperm.xlu0 %1462, %v275_v48  }
 0x129   : > { %v660_v49 = vpop.permute.xlu2 %659  ;;  %v610_v50 = vpop.permute.xlu1 %609 }
 0x12a   : > { %v1013_v51 = vmul.f32 %v660_v49, %v1649_v37  ;;  %v1003_v52 = vmul.f32 %v610_v50, %v1649_v37  ;;  %v605_v53 = vpop.permute.xlu0 %604 }
 0x12b   : > { %v1002_v54 = vmul.f32 %v605_v53, %v1649_v37 }
 0x12c   : > { %v1144_v55 = vadd.f32 %v1654_v39, %v1013_v51  ;;  %v1134_v56 = vadd.f32 %v1654_v39, %v1003_v52 }
 0x12d   : > { %v1133_v59 = vadd.f32 %v1654_v39, %v1002_v54 }
 0x12e   : > { %1272 = vst [vmem:[%s1663_s8 + $0x238] sm:$0xff] %v1144_v55  ;;  %v295_v55 = vld [vmem:[%s1607_s28 + $0x3d0] sm:$0xff] }
 0x12f   : > { %1262 = vst [vmem:[%s1663_s8 + $0x1e8] sm:$0xff] %v1134_v56  ;;  %839 = vperm.xlu2 %1464, %v280_v57   ;;  %834 = vperm.xlu1 %1463, %v279_v58   ;;  %v294_v56 = vld [vmem:[%s1607_s28 + $0x3c8] sm:$0xff]  ;;  %v293_v58 = vld [vmem:[%s1607_s28 + $0x3c0] sm:$0xff] }
 0x130   : > { %1261 = vst [vmem:[%s1663_s8 + $0x1e0] sm:$0xff] %v1133_v59  ;;  %829 = vperm.xlu0 %1462, %v278_v60  }
 0x131   : > { %v675_v61 = vpop.permute.xlu2 %674  ;;  %v625_v62 = vpop.permute.xlu1 %624 }
 0x132   : > { %v1016_v63 = vmul.f32 %v675_v61, %v1649_v37  ;;  %v1006_v0 = vmul.f32 %v625_v62, %v1649_v37  ;;  %v620_v1 = vpop.permute.xlu0 %619 }
 0x133   : > { %v1005_v2 = vmul.f32 %v620_v1, %v1649_v37 }
 0x134   : > { %v1147_v3 = vadd.f32 %v1654_v39, %v1016_v63  ;;  %v1137_v4 = vadd.f32 %v1654_v39, %v1006_v0 }
 0x135   : > { %v1136_v7 = vadd.f32 %v1654_v39, %v1005_v2 }
 0x136   : > { %1275 = vst [vmem:[%s1663_s8 + $0x250] sm:$0xff] %v1147_v3  ;;  %v298_v3 = vld [vmem:[%s1607_s28 + $0x3e8] sm:$0xff] }
 0x137   : > { %1265 = vst [vmem:[%s1663_s8 + $0x200] sm:$0xff] %v1137_v4  ;;  %854 = vperm.xlu2 %1464, %v283_v5   ;;  %849 = vperm.xlu1 %1463, %v282_v6   ;;  %v297_v4 = vld [vmem:[%s1607_s28 + $0x3e0] sm:$0xff]  ;;  %v296_v6 = vld [vmem:[%s1607_s28 + $0x3d8] sm:$0xff] }
 0x138   : > { %1264 = vst [vmem:[%s1663_s8 + $0x1f8] sm:$0xff] %v1136_v7  ;;  %844 = vperm.xlu0 %1462, %v281_v8   ;;  %v2005_v8 = vld [vmem:[%s2180_s0] sm:$0xff] }
 0x139   : > { %v690_v9 = vpop.permute.xlu2 %689  ;;  %v640_v10 = vpop.permute.xlu1 %639 }
 0x13a   : > { %v1019_v11 = vmul.f32 %v690_v9, %v1649_v37  ;;  %v1009_v12 = vmul.f32 %v640_v10, %v1649_v37  ;;  %v635_v13 = vpop.permute.xlu0 %634 }
 0x13b   : > { %v1008_v14 = vmul.f32 %v635_v13, %v1649_v37 }
 0x13c   : > { %v1150_v15 = vadd.f32 %v1654_v39, %v1019_v11  ;;  %v1140_v16 = vadd.f32 %v1654_v39, %v1009_v12  ;;  %v2013_v12 = vld [vmem:[%s2182_s2] ss:$0 sm:$0xff] }
 0x13d   : > { %v1139_v19 = vadd.f32 %v1654_v39, %v1008_v14 }
 0x13e   : > { %1278 = vst [vmem:[%s1663_s8 + $0x268] sm:$0xff] %v1150_v15  ;;  %v300_v15 = vld [vmem:[%s1607_s28 + $0x3f8] sm:$0xff] }
 0x13f   : > { %1268 = vst [vmem:[%s1663_s8 + $0x218] sm:$0xff] %v1140_v16  ;;  %869 = vperm.xlu2 %1464, %v286_v17   ;;  %864 = vperm.xlu1 %1463, %v285_v18   ;;  %v299_v17 = vld [vmem:[%s1607_s28 + $0x3f0] sm:$0xff]  ;;  %s1482_s28 = sshra.s32 %s1345_s27, 4  ;;  %s1483_s28 = int_to_ptr.hbm [resolvable:$true] %s1482_s28 }
 0x140   : > { %1267 = vst [vmem:[%s1663_s8 + $0x210] sm:$0xff] %v1139_v19  ;;  %859 = vperm.xlu0 %1462, %v284_v20   ;;  %s1484_s30 = scalar_lea.hbm %s1483_s28, 1024  ;;  %p1489_p0 = scmp.lt.s32.totalorder %s1483_s28, %s2183_s3 }
 0x141   : > { %v705_v21 = vpop.permute.xlu2 %704  ;;  %v655_v22 = vpop.permute.xlu1 %654  ;;  %p1485_p11 = scmp.ne.s32.totalorder %s1483_s28, %s1484_s30  ;;  %p1490_p1 = scmp.lt.s32.totalorder %s1488_s6, %s1484_s30 }
 0x142   : > { %v1022_v23 = vmul.f32 %v705_v21, %v1649_v37  ;;  %v1012_v24 = vmul.f32 %v655_v22, %v1649_v37  ;;  %v650_v25 = vpop.permute.xlu0 %649 }
 0x143   : > { %v1011_v26 = vmul.f32 %v650_v25, %v1649_v37  ;;  %p1486_p12 = pnand %p1485_p11, %p1593_p5  ;;  %p1491_p2 = por %p1490_p1, %p1489_p0 }
 0x144   : > { %v1153_v27 = vadd.f32 %v1654_v39, %v1022_v23  ;;  %v1143_v28 = vadd.f32 %v1654_v39, %v1012_v24 }
 0x145   : > { %v1142_v31 = vadd.f32 %v1654_v39, %v1011_v26  ;;  %p1487_p13 = pneg %p1486_p12 }
 0x146   : > { %1281 = vst [vmem:[%s1663_s8 + $0x280] sm:$0xff] %v1153_v27 }
 0x147   : > { %1271 = vst [vmem:[%s1663_s8 + $0x230] sm:$0xff] %v1143_v28  ;;  %884 = vperm.xlu2 %1464, %v289_v29   ;;  %879 = vperm.xlu1 %1463, %v288_v30   ;;  %p1492_p3 = pnand %p1491_p2, %p1487_p13 }
 0x148   : > { %1270 = vst [vmem:[%s1663_s8 + $0x228] sm:$0xff] %v1142_v31  ;;  %874 = vperm.xlu0 %1462, %v287_v32  }
 0x149   : > { %v720_v33 = vpop.permute.xlu2 %719  ;;  %v670_v34 = vpop.permute.xlu1 %669 }
 0x14a   : > { %v1025_v35 = vmul.f32 %v720_v33, %v1649_v37  ;;  %v1015_v36 = vmul.f32 %v670_v34, %v1649_v37  ;;  %v665_v38 = vpop.permute.xlu0 %664 }
 0x14b   : > { %v1014_v40 = vmul.f32 %v665_v38, %v1649_v37 }
 0x14c   : > { %v1156_v41 = vadd.f32 %v1654_v39, %v1025_v35  ;;  %v1146_v42 = vadd.f32 %v1654_v39, %v1015_v36 }
 0x14d   : > { %v1145_v45 = vadd.f32 %v1654_v39, %v1014_v40 }
 0x14e   : > { %1284 = vst [vmem:[%s1663_s8 + $0x298] sm:$0xff] %v1156_v41 }
 0x14f   : > { %1274 = vst [vmem:[%s1663_s8 + $0x248] sm:$0xff] %v1146_v42  ;;  %899 = vperm.xlu2 %1464, %v292_v43   ;;  %894 = vperm.xlu1 %1463, %v291_v44  }
 0x150   : > { %1273 = vst [vmem:[%s1663_s8 + $0x240] sm:$0xff] %v1145_v45  ;;  %889 = vperm.xlu0 %1462, %v290_v46  }
 0x151   : > { %v735_v47 = vpop.permute.xlu2 %734  ;;  %v685_v48 = vpop.permute.xlu1 %684 }
 0x152   : > { %v1028_v49 = vmul.f32 %v735_v47, %v1649_v37  ;;  %v1018_v50 = vmul.f32 %v685_v48, %v1649_v37  ;;  %v680_v51 = vpop.permute.xlu0 %679 }
 0x153   : > { %v1017_v52 = vmul.f32 %v680_v51, %v1649_v37 }
 0x154   : > { %v1159_v53 = vadd.f32 %v1654_v39, %v1028_v49  ;;  %v1149_v54 = vadd.f32 %v1654_v39, %v1018_v50 }
 0x155   : > { %v1148_v57 = vadd.f32 %v1654_v39, %v1017_v52 }
 0x156   : > { %1287 = vst [vmem:[%s1663_s8 + $0x2b0] sm:$0xff] %v1159_v53 }
 0x157   : > { %1277 = vst [vmem:[%s1663_s8 + $0x260] sm:$0xff] %v1149_v54  ;;  %914 = vperm.xlu2 %1464, %v295_v55   ;;  %909 = vperm.xlu1 %1463, %v294_v56  }
 0x158   : > { %1276 = vst [vmem:[%s1663_s8 + $0x258] sm:$0xff] %v1148_v57  ;;  %904 = vperm.xlu0 %1462, %v293_v58  }
 0x159   : > { %v750_v59 = vpop.permute.xlu2 %749  ;;  %v700_v60 = vpop.permute.xlu1 %699 }
 0x15a   : > { %v1031_v61 = vmul.f32 %v750_v59, %v1649_v37  ;;  %v1021_v62 = vmul.f32 %v700_v60, %v1649_v37  ;;  %v695_v63 = vpop.permute.xlu0 %694 }
 0x15b   : > { %v1020_v0 = vmul.f32 %v695_v63, %v1649_v37 }
 0x15c   : > { %v1162_v1 = vadd.f32 %v1654_v39, %v1031_v61  ;;  %v1152_v2 = vadd.f32 %v1654_v39, %v1021_v62 }
 0x15d   : > { %v1151_v5 = vadd.f32 %v1654_v39, %v1020_v0 }
 0x15e   : > { %1290 = vst [vmem:[%s1663_s8 + $0x2c8] sm:$0xff] %v1162_v1 }
 0x15f   : > { %1280 = vst [vmem:[%s1663_s8 + $0x278] sm:$0xff] %v1152_v2  ;;  %929 = vperm.xlu2 %1464, %v298_v3   ;;  %924 = vperm.xlu1 %1463, %v297_v4  }
 0x160   : > { %1279 = vst [vmem:[%s1663_s8 + $0x270] sm:$0xff] %v1151_v5  ;;  %919 = vperm.xlu0 %1462, %v296_v6  }
 0x161   : > { %v765_v37 = vpop.permute.xlu2 %764  ;;  %v715_v7 = vpop.permute.xlu1 %714 }
 0x162   : > { %v1034_v39 = vmul.f32 %v2005_v8, %v765_v37  ;;  %v1024_v9 = vmul.f32 %v2005_v8, %v715_v7  ;;  %v710_v10 = vpop.permute.xlu0 %709 }
 0x163   : > { %v1023_v11 = vmul.f32 %v2005_v8, %v710_v10 }
 0x164   : > { %v1165_v13 = vadd.f32 %v2013_v12, %v1034_v39  ;;  %v1155_v14 = vadd.f32 %v2013_v12, %v1024_v9 }
 0x165   : > { %v1154_v16 = vadd.f32 %v2013_v12, %v1023_v11 }
 0x166   : > { %1293 = vst [vmem:[%s1663_s8 + $0x2e0] sm:$0xff] %v1165_v13 }
 0x167   : > { %1283 = vst [vmem:[%s1663_s8 + $0x290] sm:$0xff] %v1155_v14  ;;  %939 = vperm.xlu1 %1463, %v300_v15  }
 0x168   : > { %1282 = vst [vmem:[%s1663_s8 + $0x288] sm:$0xff] %v1154_v16  ;;  %934 = vperm.xlu0 %1462, %v299_v17  }
 0x169   : > { %v780_v18 = vpop.permute.xlu2 %779  ;;  %v730_v19 = vpop.permute.xlu1 %729 }
 0x16a   : > { %v1037_v20 = vmul.f32 %v2005_v8, %v780_v18  ;;  %v1027_v21 = vmul.f32 %v2005_v8, %v730_v19  ;;  %v725_v22 = vpop.permute.xlu0 %724 }
 0x16b   : > { %v1026_v23 = vmul.f32 %v2005_v8, %v725_v22 }
 0x16c   : > { %v1168_v24 = vadd.f32 %v2013_v12, %v1037_v20  ;;  %v1158_v25 = vadd.f32 %v2013_v12, %v1027_v21 }
 0x16d   : > { %v1157_v26 = vadd.f32 %v2013_v12, %v1026_v23 }
 0x16e   : > { %1296 = vst [vmem:[%s1663_s8 + $0x2f8] sm:$0xff] %v1168_v24 }
 0x16f   : > { %1286 = vst [vmem:[%s1663_s8 + $0x2a8] sm:$0xff] %v1158_v25 }
 0x170   : > { %1285 = vst [vmem:[%s1663_s8 + $0x2a0] sm:$0xff] %v1157_v26 }
 0x171   : > { %v795_v27 = vpop.permute.xlu2 %794  ;;  %v745_v28 = vpop.permute.xlu1 %744 }
 0x172   : > { %v1040_v29 = vmul.f32 %v2005_v8, %v795_v27  ;;  %v1030_v30 = vmul.f32 %v2005_v8, %v745_v28  ;;  %v740_v31 = vpop.permute.xlu0 %739 }
 0x173   : > { %v1029_v32 = vmul.f32 %v2005_v8, %v740_v31 }
 0x174   : > { %v1171_v33 = vadd.f32 %v2013_v12, %v1040_v29  ;;  %v1161_v34 = vadd.f32 %v2013_v12, %v1030_v30 }
 0x175   : > { %v1160_v35 = vadd.f32 %v2013_v12, %v1029_v32 }
 0x176   : > { %1299 = vst [vmem:[%s1663_s8 + $0x310] sm:$0xff] %v1171_v33 }
 0x177   : > { %1289 = vst [vmem:[%s1663_s8 + $0x2c0] sm:$0xff] %v1161_v34 }
 0x178   : > { %1288 = vst [vmem:[%s1663_s8 + $0x2b8] sm:$0xff] %v1160_v35 }
 0x179   : > { %v810_v36 = vpop.permute.xlu2 %809  ;;  %v760_v38 = vpop.permute.xlu1 %759 }
 0x17a   : > { %v1043_v40 = vmul.f32 %v2005_v8, %v810_v36  ;;  %v1033_v41 = vmul.f32 %v2005_v8, %v760_v38  ;;  %v755_v42 = vpop.permute.xlu0 %754 }
 0x17b   : > { %v1032_v43 = vmul.f32 %v2005_v8, %v755_v42 }
 0x17c   : > { %v1174_v44 = vadd.f32 %v2013_v12, %v1043_v40  ;;  %v1164_v45 = vadd.f32 %v2013_v12, %v1033_v41 }
 0x17d   : > { %v1163_v46 = vadd.f32 %v2013_v12, %v1032_v43 }
 0x17e   : > { %1302 = vst [vmem:[%s1663_s8 + $0x328] sm:$0xff] %v1174_v44 }
 0x17f   : > { %1292 = vst [vmem:[%s1663_s8 + $0x2d8] sm:$0xff] %v1164_v45 }
 0x180   : > { %1291 = vst [vmem:[%s1663_s8 + $0x2d0] sm:$0xff] %v1163_v46 }
 0x181   : > { %v825_v47 = vpop.permute.xlu2 %824  ;;  %v775_v48 = vpop.permute.xlu1 %774 }
 0x182   : > { %v1046_v49 = vmul.f32 %v2005_v8, %v825_v47  ;;  %v1036_v50 = vmul.f32 %v2005_v8, %v775_v48  ;;  %v770_v51 = vpop.permute.xlu0 %769 }
 0x183   : > { %v1035_v52 = vmul.f32 %v2005_v8, %v770_v51 }
 0x184   : > { %v1177_v53 = vadd.f32 %v2013_v12, %v1046_v49  ;;  %v1167_v54 = vadd.f32 %v2013_v12, %v1036_v50 }
 0x185   : > { %v1166_v55 = vadd.f32 %v2013_v12, %v1035_v52 }
 0x186   : > { %1305 = vst [vmem:[%s1663_s8 + $0x340] sm:$0xff] %v1177_v53 }
 0x187   : > { %1295 = vst [vmem:[%s1663_s8 + $0x2f0] sm:$0xff] %v1167_v54 }
 0x188   : > { %1294 = vst [vmem:[%s1663_s8 + $0x2e8] sm:$0xff] %v1166_v55 }
 0x189   : > { %v840_v56 = vpop.permute.xlu2 %839  ;;  %v790_v57 = vpop.permute.xlu1 %789 }
 0x18a   : > { %v1049_v58 = vmul.f32 %v2005_v8, %v840_v56  ;;  %v1039_v59 = vmul.f32 %v2005_v8, %v790_v57  ;;  %v785_v60 = vpop.permute.xlu0 %784 }
 0x18b   : > { %v1038_v61 = vmul.f32 %v2005_v8, %v785_v60 }
 0x18c   : > { %v1180_v62 = vadd.f32 %v2013_v12, %v1049_v58  ;;  %v1170_v63 = vadd.f32 %v2013_v12, %v1039_v59 }
 0x18d   : > { %v1169_v0 = vadd.f32 %v2013_v12, %v1038_v61 }
 0x18e   : > { %1308 = vst [vmem:[%s1663_s8 + $0x358] sm:$0xff] %v1180_v62 }
 0x18f   : > { %1298 = vst [vmem:[%s1663_s8 + $0x308] sm:$0xff] %v1170_v63 }
 0x190   : > { %1297 = vst [vmem:[%s1663_s8 + $0x300] sm:$0xff] %v1169_v0 }
 0x191   : > { %v855_v1 = vpop.permute.xlu2 %854  ;;  %v805_v2 = vpop.permute.xlu1 %804 }
 0x192   : > { %v1052_v3 = vmul.f32 %v2005_v8, %v855_v1  ;;  %v1042_v4 = vmul.f32 %v2005_v8, %v805_v2  ;;  %v800_v5 = vpop.permute.xlu0 %799 }
 0x193   : > { %v1041_v6 = vmul.f32 %v2005_v8, %v800_v5 }
 0x194   : > { %v1183_v37 = vadd.f32 %v2013_v12, %v1052_v3  ;;  %v1173_v7 = vadd.f32 %v2013_v12, %v1042_v4 }
 0x195   : > { %v1172_v39 = vadd.f32 %v2013_v12, %v1041_v6 }
 0x196   : > { %1311 = vst [vmem:[%s1663_s8 + $0x370] sm:$0xff] %v1183_v37 }
 0x197   : > { %1301 = vst [vmem:[%s1663_s8 + $0x320] sm:$0xff] %v1173_v7 }
 0x198   : > { %1300 = vst [vmem:[%s1663_s8 + $0x318] sm:$0xff] %v1172_v39 }
 0x199   : > { %v870_v9 = vpop.permute.xlu2 %869  ;;  %v820_v10 = vpop.permute.xlu1 %819 }
 0x19a   : > { %v1055_v11 = vmul.f32 %v2005_v8, %v870_v9  ;;  %v1045_v13 = vmul.f32 %v2005_v8, %v820_v10  ;;  %v815_v14 = vpop.permute.xlu0 %814 }
 0x19b   : > { %v1044_v15 = vmul.f32 %v2005_v8, %v815_v14 }
 0x19c   : > { %v1186_v16 = vadd.f32 %v2013_v12, %v1055_v11  ;;  %v1176_v17 = vadd.f32 %v2013_v12, %v1045_v13 }
 0x19d   : > { %v1175_v18 = vadd.f32 %v2013_v12, %v1044_v15 }
 0x19e   : > { %1314 = vst [vmem:[%s1663_s8 + $0x388] sm:$0xff] %v1186_v16 }
 0x19f   : > { %1304 = vst [vmem:[%s1663_s8 + $0x338] sm:$0xff] %v1176_v17 }
 0x1a0   : > { %1303 = vst [vmem:[%s1663_s8 + $0x330] sm:$0xff] %v1175_v18 }
 0x1a1   : > { %v885_v19 = vpop.permute.xlu2 %884  ;;  %v835_v20 = vpop.permute.xlu1 %834 }
 0x1a2   : > { %v1058_v21 = vmul.f32 %v2005_v8, %v885_v19  ;;  %v1048_v22 = vmul.f32 %v2005_v8, %v835_v20  ;;  %v830_v23 = vpop.permute.xlu0 %829 }
 0x1a3   : > { %v1047_v24 = vmul.f32 %v2005_v8, %v830_v23 }
 0x1a4   : > { %v1189_v25 = vadd.f32 %v2013_v12, %v1058_v21  ;;  %v1179_v26 = vadd.f32 %v2013_v12, %v1048_v22 }
 0x1a5   : > { %v1178_v27 = vadd.f32 %v2013_v12, %v1047_v24 }
 0x1a6   : > { %1317 = vst [vmem:[%s1663_s8 + $0x3a0] sm:$0xff] %v1189_v25 }
 0x1a7   : > { %1307 = vst [vmem:[%s1663_s8 + $0x350] sm:$0xff] %v1179_v26 }
 0x1a8   : > { %1306 = vst [vmem:[%s1663_s8 + $0x348] sm:$0xff] %v1178_v27 }
 0x1a9   : > { %v900_v28 = vpop.permute.xlu2 %899  ;;  %v850_v29 = vpop.permute.xlu1 %849 }
 0x1aa   : > { %v1061_v30 = vmul.f32 %v2005_v8, %v900_v28  ;;  %v1051_v31 = vmul.f32 %v2005_v8, %v850_v29  ;;  %v845_v32 = vpop.permute.xlu0 %844 }
 0x1ab   : > { %v1050_v33 = vmul.f32 %v2005_v8, %v845_v32 }
 0x1ac   : > { %v1192_v34 = vadd.f32 %v2013_v12, %v1061_v30  ;;  %v1182_v35 = vadd.f32 %v2013_v12, %v1051_v31 }
 0x1ad   : > { %v1181_v36 = vadd.f32 %v2013_v12, %v1050_v33 }
 0x1ae   : > { %1320 = vst [vmem:[%s1663_s8 + $0x3b8] sm:$0xff] %v1192_v34 }
 0x1af   : > { %1310 = vst [vmem:[%s1663_s8 + $0x368] sm:$0xff] %v1182_v35 }
 0x1b0   : > { %1309 = vst [vmem:[%s1663_s8 + $0x360] sm:$0xff] %v1181_v36 }
 0x1b1   : > { %v915_v38 = vpop.permute.xlu2 %914  ;;  %v865_v40 = vpop.permute.xlu1 %864 }
 0x1b2   : > { %v1064_v41 = vmul.f32 %v2005_v8, %v915_v38  ;;  %v1054_v42 = vmul.f32 %v2005_v8, %v865_v40  ;;  %v860_v43 = vpop.permute.xlu0 %859 }
 0x1b3   : > { %v1053_v44 = vmul.f32 %v2005_v8, %v860_v43 }
 0x1b4   : > { %v1195_v45 = vadd.f32 %v2013_v12, %v1064_v41  ;;  %v1185_v46 = vadd.f32 %v2013_v12, %v1054_v42 }
 0x1b5   : > { %v1184_v47 = vadd.f32 %v2013_v12, %v1053_v44 }
 0x1b6   : > { %1323 = vst [vmem:[%s1663_s8 + $0x3d0] sm:$0xff] %v1195_v45 }
 0x1b7   : > { %1313 = vst [vmem:[%s1663_s8 + $0x380] sm:$0xff] %v1185_v46 }
 0x1b8   : > { %1312 = vst [vmem:[%s1663_s8 + $0x378] sm:$0xff] %v1184_v47 }
 0x1b9   : > { %v930_v48 = vpop.permute.xlu2 %929  ;;  %v880_v49 = vpop.permute.xlu1 %879 }
 0x1ba   : > { %v1067_v50 = vmul.f32 %v2005_v8, %v930_v48  ;;  %v1057_v51 = vmul.f32 %v2005_v8, %v880_v49  ;;  %v875_v52 = vpop.permute.xlu0 %874 }
 0x1bb   : > { %v1056_v53 = vmul.f32 %v2005_v8, %v875_v52 }
 0x1bc   : > { %v1198_v54 = vadd.f32 %v2013_v12, %v1067_v50  ;;  %v1188_v55 = vadd.f32 %v2013_v12, %v1057_v51 }
 0x1bd   : > { %v1187_v56 = vadd.f32 %v2013_v12, %v1056_v53 }
 0x1be   : > { %1326 = vst [vmem:[%s1663_s8 + $0x3e8] sm:$0xff] %v1198_v54 }
 0x1bf   : > { %1316 = vst [vmem:[%s1663_s8 + $0x398] sm:$0xff] %v1188_v55 }
 0x1c0   : > { %1315 = vst [vmem:[%s1663_s8 + $0x390] sm:$0xff] %v1187_v56 }
 0x1c1   : > { %v895_v57 = vpop.permute.xlu1 %894 }
 0x1c2   : > { %v1060_v58 = vmul.f32 %v2005_v8, %v895_v57  ;;  %v890_v59 = vpop.permute.xlu0 %889 }
 0x1c3   : > { %v1059_v60 = vmul.f32 %v2005_v8, %v890_v59 }
 0x1c4   : > { %v1191_v61 = vadd.f32 %v2013_v12, %v1060_v58 }
 0x1c5   : > { %v1190_v62 = vadd.f32 %v2013_v12, %v1059_v60 }
 0x1c6   : > { %1319 = vst [vmem:[%s1663_s8 + $0x3b0] sm:$0xff] %v1191_v61 }
 0x1c7   : > { %1318 = vst [vmem:[%s1663_s8 + $0x3a8] sm:$0xff] %v1190_v62 }
 0x1c9   : > { %v910_v63 = vpop.permute.xlu1 %909 }
 0x1ca   : > { %v1063_v0 = vmul.f32 %v2005_v8, %v910_v63  ;;  %v905_v1 = vpop.permute.xlu0 %904 }
 0x1cb   : > { %v1062_v2 = vmul.f32 %v2005_v8, %v905_v1 }
 0x1cc   : > { %v1194_v3 = vadd.f32 %v2013_v12, %v1063_v0 }
 0x1cd   : > { %v1193_v4 = vadd.f32 %v2013_v12, %v1062_v2 }
 0x1ce   : > { %1322 = vst [vmem:[%s1663_s8 + $0x3c8] sm:$0xff] %v1194_v3 }
 0x1cf   : > { %1321 = vst [vmem:[%s1663_s8 + $0x3c0] sm:$0xff] %v1193_v4 }
 0x1d1   : > { %v925_v5 = vpop.permute.xlu1 %924 }
 0x1d2   : > { %v1066_v6 = vmul.f32 %v2005_v8, %v925_v5  ;;  %v920_v37 = vpop.permute.xlu0 %919 }
 0x1d3   : > { %v1065_v7 = vmul.f32 %v2005_v8, %v920_v37 }
 0x1d4   : > { %v1197_v39 = vadd.f32 %v2013_v12, %v1066_v6 }
 0x1d5   : > { %v1196_v9 = vadd.f32 %v2013_v12, %v1065_v7 }
 0x1d6   : > { %1325 = vst [vmem:[%s1663_s8 + $0x3e0] sm:$0xff] %v1197_v39 }
 0x1d7   : > { %1324 = vst [vmem:[%s1663_s8 + $0x3d8] sm:$0xff] %v1196_v9 }
 0x1d9   : > { %v940_v10 = vpop.permute.xlu1 %939 }
 0x1da   : > { %v1069_v11 = vmul.f32 %v2005_v8, %v940_v10  ;;  %v935_v13 = vpop.permute.xlu0 %934 }
 0x1db   : > { %v1068_v14 = vmul.f32 %v2005_v8, %v935_v13 }
 0x1dc   : > { %v1200_v15 = vadd.f32 %v2013_v12, %v1069_v11 }
 0x1dd   : > { %v1199_v16 = vadd.f32 %v2013_v12, %v1068_v14 }
 0x1de   : > { %1328 = vst [vmem:[%s1663_s8 + $0x3f8] sm:$0xff] %v1200_v15 }
 0x1df   : > { %1327 = vst [vmem:[%s1663_s8 + $0x3f0] sm:$0xff] %v1199_v16 }
 0x1e0   : > { %1495 = shalt.err (!%p1492_p3)
}
 0x1e1   : > { %s1533_s29 = smov 128   ;;  %s1534_s8 = smov 8  }
 0x1e2   : > { %1420 = dma.vmem_to_hbm [thread:$0]  (%p1593_p5), %s1343_s26, 16384, %s1345_s27, %s1330_s16, %s1533_s29, %s1533_s29, %s1534_s8  }
 0x1e3 PF: > { %p1426_p4 = scmp.ge.s32.totalorder %s1530_s15, 2  ;;  %s1359_s10 = sand.u32 1, %s1518_s12  }
 0x1e4   : > { %s1360_s11 = scalar_lea.sflag [#allocation3], %s1359_s10 }
 0x1e5   : > { %p1423_p7 = pnand %p1426_p4, %p1597_p6 }
 0x1e7   : > { %p1424_p8 = pneg %p1423_p7 }
 0x1e9   : > { %1513 = dma.done.wait (%p1424_p8), %s1360_s11, 16384  }
 0x1ea   : > { %1515 = vsyncadd (%p1424_p8), %s1360_s11, 4294950912  ;;  %p13_p9 = scmp.ge.s32.totalorder %s1580_s18, 6   ;;  %s2186_s12 = smov %s1522_s13 }
 0x1eb   : > { %s2187_s13 = smov %s1526_s14  ;;  %s2188_s14 = smov %s1591_s21 }
 0x1ec   : > { %s2189_s15 = smov %s1580_s18  ;;  %15 = sbr.rel (!%p13_p9) target bundleno = 3 (0x3), region = 67 }
 0x1f1   :  { %1366 = vsyncpa [#allocation3], 1 }
 0x1f2   :  { %1368 = vsyncpa [#allocation3 + $0x1], 1 }

</bundles_post_ra>
